<compile_context>
chip_gen: v7x
topology: tpu7x:2x2x1
jax: 0.10.0
libtpu: 0.0.40
codegen_flags: <defaults>
</compile_context>

<pallas_src>
import jax
import jax.numpy as jnp
from jax.experimental import pallas as pl
from jax.experimental.pallas import tpu as pltpu


def _leaky_relu(x):
    return jnp.where(x > 0, x, 0.01 * x)


def ner_kernel(state_row_ref, state_full_ref, cos_row_ref, sin_row_ref,
               cos_full_ref, sin_full_ref,
               wh_ref, bh_ref, wt_ref, bt_ref,
               wq_ref, bq_ref, wk_ref, bk_ref,
               uw_ref, wa_ref, wc_ref, bias_ref,
               out_ref, ut_ref, ct_ref):
    f32 = jnp.float32
    bf16 = jnp.bfloat16

    Bz = wh_ref.shape[1]              # biaffine_size
    T, tm, S = out_ref.shape          # num_ner_tag, row tile, full seq

    def linear(x, w_ref, b_ref):
        y = jax.lax.dot_general(x, w_ref[...], (((1,), (0,)), ((), ())),
                                preferred_element_type=f32)
        return y + b_ref[...]

    def rope(x, cosp, sinp):
        # torch: x2 = stack([-x[..., 1::2], x[..., ::2]], -1).reshape(x.shape)
        n = x.shape[0]
        even = (jax.lax.broadcasted_iota(jnp.int32, (n, Bz), 1) % 2) == 0
        x_next = pltpu.roll(x, Bz - 1, 1)   # x[:, i+1] lands at column i (XLU)
        x_prev = pltpu.roll(x, 1, 1)        # x[:, i-1] lands at column i
        x2 = jnp.where(even, -x_next, x_prev)
        return jax.nn.sigmoid(x * cosp + x2 * sinp)

    # ---- per-batch precompute (tail path), once per batch at row tile 0 ----
    @pl.when(pl.program_id(1) == 0)
    def _():
        st = state_full_ref[...]                                  # (S, H) bf16
        tail = _leaky_relu(linear(st, wt_ref, bt_ref))            # (S, Bz)
        tail = tail + rope(linear(st, wk_ref, bk_ref),
                           cos_full_ref[...], sin_full_ref[...])
        tail_b = tail.astype(bf16)
        # Stacked bilinear right factor: rows [t*Bz:(t+1)*Bz] = U_t @ tail^T.
        ut = jax.lax.dot_general(uw_ref[...], tail_b,
                                 (((1,), (1,)), ((), ())),
                                 preferred_element_type=f32)      # (T*Bz, S)
        ut_ref[...] = ut.astype(bf16)
        # Tail-side affine term + all folded biases.
        ct = jax.lax.dot_general(wc_ref[...], tail_b,
                                 (((1,), (1,)), ((), ())),
                                 preferred_element_type=f32)      # (T, S)
        ct_ref[...] = ct + bias_ref[...]

    # ---- per-row-tile head path ---------------------------------------------
    st_m = state_row_ref[...]                                     # (tm, H)
    head = _leaky_relu(linear(st_m, wh_ref, bh_ref))              # (tm, Bz)
    head = head + rope(linear(st_m, wq_ref, bq_ref),
                       cos_row_ref[...], sin_row_ref[...])
    head_b = head.astype(bf16)

    ah = jax.lax.dot_general(head_b, wa_ref[...], (((1,), (1,)), ((), ())),
                             preferred_element_type=f32)          # (tm, T)
    ct = ct_ref[...]                                              # (T, S)

    # Bilinear + rank-1 affine terms; T = num_ner_tag is tiny → static unroll.
    # TODO(synk): MCattention(scores) residual term skipped (source missing).
    for t in range(T):
        bil = jax.lax.dot_general(head_b, ut_ref[pl.ds(t * Bz, Bz), :],
                                  (((1,), (0,)), ((), ())),
                                  preferred_element_type=f32)     # (tm, S)
        out_ref[t] = bil + ah[:, t:t + 1] + ct[t:t + 1, :]


def ner_scores(state, params, cos_pos, sin_pos, *, tm=None,
               vmem_limit_bytes=None):
    B, S, H = state.shape
    Bz = params["wh"].shape[0]
    T = params["wd"].shape[0]

    # Row tile of the pairwise (S x S) output: full S for small sequences,
    # 128-row tiles otherwise (keeps per-step VMEM small on v7x).
    if tm is None:
        tm = 128 if (S > 128 and S % 128 == 0) else S
    assert S % tm == 0 and (tm == S or tm % 8 == 0)
    n_m = S // tm

    f32, bf16 = jnp.float32, jnp.bfloat16
    wd = params["wd"].astype(f32)                     # (T, K)
    W = params["W"].astype(f32)                       # (K, 2*Bz + 2)

    # --- fold down_fc into the biaffine weights (one-time, tiny) ------------
    UW = jnp.einsum("tk,kij->tij", wd, params["U"])                # (T,Bz,Bz)
    UW_flat = UW.reshape(T * Bz, Bz).astype(bf16)                  # (T*Bz,Bz)
    WA = (wd @ W[:, :Bz]).astype(bf16)                             # head side
    WC = (wd @ W[:, Bz + 1:2 * Bz + 1]).astype(bf16)               # tail side
    bias_total = params["bd"] + wd @ W[:, Bz] + wd @ W[:, 2 * Bz + 1]
    bias_total = bias_total.reshape(T, 1).astype(f32)              # (T, 1)

    # nn.Linear stores (out, in); pre-transpose so the kernel does x @ W.
    wh_t = params["wh"].T.astype(bf16)
    wt_t = params["wt"].T.astype(bf16)
    wq_t = params["wr"][:Bz].T.astype(bf16)     # RoPE dense, qw half
    wk_t = params["wr"][Bz:].T.astype(bf16)     # RoPE dense, kw half
    bh = params["bh"].reshape(1, Bz).astype(f32)
    bt = params["bt"].reshape(1, Bz).astype(f32)
    bq = params["br"][:Bz].reshape(1, Bz).astype(f32)
    bk = params["br"][Bz:].reshape(1, Bz).astype(f32)

    state_b = state.astype(bf16)
    cos_f = cos_pos.astype(f32)
    sin_f = sin_pos.astype(f32)

    def const(shape):
        nd = len(shape)
        return pl.BlockSpec(shape, lambda b, m, _n=nd: (0,) * _n)

    in_specs = [
        pl.BlockSpec((None, tm, H), lambda b, m: (b, m, 0)),   # state, head rows
        pl.BlockSpec((None, S, H), lambda b, m: (b, 0, 0)),    # state, full (tail)
        pl.BlockSpec((tm, Bz), lambda b, m: (m, 0)),           # cos, head rows
        pl.BlockSpec((tm, Bz), lambda b, m: (m, 0)),           # sin, head rows
        const((S, Bz)), const((S, Bz)),                        # cos/sin full
        const((H, Bz)), const((1, Bz)),                        # head_mlp
        const((H, Bz)), const((1, Bz)),                        # tail_mlp
        const((H, Bz)), const((1, Bz)),                        # rope dense (q)
        const((H, Bz)), const((1, Bz)),                        # rope dense (k)
        const((T * Bz, Bz)),                                   # UW = Wd . U
        const((T, Bz)), const((T, Bz)), const((T, 1)),         # WA, WC, bias
    ]
    # Lane-dense output: (B, T, S, S) with S on the lane axis.
    out_specs = pl.BlockSpec((None, T, tm, S), lambda b, m: (b, 0, m, 0))

    out_tss = pl.pallas_call(
        ner_kernel,
        out_shape=jax.ShapeDtypeStruct((B, T, S, S), jnp.float32),
        grid=(B, n_m),
        in_specs=in_specs,
        out_specs=out_specs,
        scratch_shapes=[pltpu.VMEM((T * Bz, S), bf16),    # stacked U_t @ tail^T
                        pltpu.VMEM((T, S), jnp.float32)], # tail affine + bias
        compiler_params=pltpu.CompilerParams(
            dimension_semantics=("parallel", "arbitrary"),
            vmem_limit_bytes=vmem_limit_bytes),
    )(state_b, state_b, cos_f, sin_f, cos_f, sin_f,
      wh_t, bh, wt_t, bt, wq_t, bq, wk_t, bk,
      UW_flat, WA, WC, bias_total)

    # Back to the PyTorch layout (B, S, S, T).
    return jnp.transpose(out_tss, (0, 2, 3, 1))


def init_params(key, H, Bz, K, T):
    ks = jax.random.split(key, 10)

    def n(k, shape, scale=0.1):
        return scale * jax.random.normal(k, shape, dtype=jnp.float32)

    return dict(
        wh=n(ks[0], (Bz, H)), bh=n(ks[1], (Bz,)),
        wt=n(ks[2], (Bz, H)), bt=n(ks[3], (Bz,)),
        wr=n(ks[4], (2 * Bz, H)), br=n(ks[5], (2 * Bz,)),
        U=n(ks[6], (K, Bz, Bz)),
        W=n(ks[7], (K, 2 * Bz + 2)),
        wd=n(ks[8], (T, K)), bd=n(ks[9], (T,)),
    )


def ner_reference(state, params, cos_pos, sin_pos):
    """Pure-JAX f32 mirror of the PyTorch eval forward (from `state` onward)."""
    Bz = params["wh"].shape[0]
    head = _leaky_relu(state @ params["wh"].T + params["bh"])
    tail = _leaky_relu(state @ params["wt"].T + params["bt"])
    rp = state @ params["wr"].T + params["br"]
    qw, kw = rp[..., :Bz], rp[..., Bz:]

    def rot(x):
        x2 = jnp.stack([-x[..., 1::2], x[..., ::2]], axis=-1).reshape(x.shape)
        return jax.nn.sigmoid(x * cos_pos + x2 * sin_pos)

    head = head + rot(qw)
    tail = tail + rot(kw)
    s1 = jnp.einsum("bxi,oij,byj->boxy", head, params["U"], tail)
    h1 = jnp.concatenate([head, jnp.ones_like(head[..., :1])], axis=-1)
    t1 = jnp.concatenate([tail, jnp.ones_like(tail[..., :1])], axis=-1)
    B, S = head.shape[0], head.shape[1]
    cat = jnp.concatenate(
        [jnp.broadcast_to(h1[:, :, None, :], (B, S, S, Bz + 1)),
         jnp.broadcast_to(t1[:, None, :, :], (B, S, S, Bz + 1))], axis=-1)
    s2 = jnp.einsum("bmnh,kh->bkmn", cat, params["W"])
    scores = s1 + s2
    return jnp.einsum("bkmn,tk->bmnt", scores, params["wd"]) + params["bd"]


if __name__ == "__main__":
    # batch, seq, hidden, biaffine_size, cnn_dim, num_ner_tag
    B, S, H, Bz, K, T = 2, 8, 32, 16, 8, 4
    key = jax.random.PRNGKey(0)
    kx, kp = jax.random.split(key)
    state = jax.random.normal(kx, (B, S, H), dtype=jnp.float32)
    params = init_params(kp, H, Bz, K, T)

    # sinusoidal_position_embedding -> interleaved [sin0,cos0,sin1,cos1,...],
    # then repeat_interleave(2) of the cos / sin halves.
    pos = jnp.arange(S, dtype=jnp.float32)[:, None]
    idx = jnp.arange(Bz // 2, dtype=jnp.float32)
    theta = jnp.power(10000.0, -2.0 * idx / Bz)
    ang = pos * theta                                   # (S, Bz//2)
    cos_pos = jnp.repeat(jnp.cos(ang), 2, axis=-1)      # (S, Bz)
    sin_pos = jnp.repeat(jnp.sin(ang), 2, axis=-1)      # (S, Bz)

    out = jax.block_until_ready(ner_scores(state, params, cos_pos, sin_pos))
    ref = ner_reference(state, params, cos_pos, sin_pos)
    assert out.shape == (B, S, S, T)
    assert jnp.allclose(out, ref, atol=5e-2, rtol=5e-2), \
        float(jnp.max(jnp.abs(out - ref)))
    print("KERNEL_OK")
</pallas_src>

<mosaic_0001>
module attributes {stable_mosaic.version = 11 : i64} {
  func.func @ner_kernel(%arg0: i32, %arg1: i32, %arg2: memref<1x8x32xbf16, #tpu.memory_space<vmem>>, %arg3: memref<1x8x32xbf16, #tpu.memory_space<vmem>>, %arg4: memref<8x16xf32, #tpu.memory_space<vmem>>, %arg5: memref<8x16xf32, #tpu.memory_space<vmem>>, %arg6: memref<8x16xf32, #tpu.memory_space<vmem>>, %arg7: memref<8x16xf32, #tpu.memory_space<vmem>>, %arg8: memref<32x16xbf16, #tpu.memory_space<vmem>>, %arg9: memref<1x16xf32, #tpu.memory_space<vmem>>, %arg10: memref<32x16xbf16, #tpu.memory_space<vmem>>, %arg11: memref<1x16xf32, #tpu.memory_space<vmem>>, %arg12: memref<32x16xbf16, #tpu.memory_space<vmem>>, %arg13: memref<1x16xf32, #tpu.memory_space<vmem>>, %arg14: memref<32x16xbf16, #tpu.memory_space<vmem>>, %arg15: memref<1x16xf32, #tpu.memory_space<vmem>>, %arg16: memref<64x16xbf16, #tpu.memory_space<vmem>>, %arg17: memref<4x16xbf16, #tpu.memory_space<vmem>>, %arg18: memref<4x16xbf16, #tpu.memory_space<vmem>>, %arg19: memref<4x1xf32, #tpu.memory_space<vmem>>, %arg20: memref<1x4x8x8xf32, #tpu.memory_space<vmem>>, %arg21: memref<64x8xbf16, #tpu.memory_space<vmem>>, %arg22: memref<4x8xf32, #tpu.memory_space<vmem>>) attributes {dimension_semantics = [#tpu.dimension_semantics<parallel>, #tpu.dimension_semantics<arbitrary>], iteration_bounds = array<i64: 2, 1>, scalar_prefetch = 0 : i64, scratch_operands = 2 : i64, tpu.core_type = #tpu.core_type<tc>, window_params = [{transform_indices = @transform_0, window_bounds = array<i64: 1, 8, 32>}, {transform_indices = @transform_1, window_bounds = array<i64: 1, 8, 32>}, {transform_indices = @transform_2, window_bounds = array<i64: 8, 16>}, {transform_indices = @transform_3, window_bounds = array<i64: 8, 16>}, {pipeline_mode = #tpu.pipeline_mode<synchronous>, transform_indices = @transform_4, window_bounds = array<i64: 8, 16>}, {pipeline_mode = #tpu.pipeline_mode<synchronous>, transform_indices = @transform_5, window_bounds = array<i64: 8, 16>}, {pipeline_mode = #tpu.pipeline_mode<synchronous>, transform_indices = @transform_6, window_bounds = array<i64: 32, 16>}, {pipeline_mode = #tpu.pipeline_mode<synchronous>, transform_indices = @transform_7, window_bounds = array<i64: 1, 16>}, {pipeline_mode = #tpu.pipeline_mode<synchronous>, transform_indices = @transform_8, window_bounds = array<i64: 32, 16>}, {pipeline_mode = #tpu.pipeline_mode<synchronous>, transform_indices = @transform_9, window_bounds = array<i64: 1, 16>}, {pipeline_mode = #tpu.pipeline_mode<synchronous>, transform_indices = @transform_10, window_bounds = array<i64: 32, 16>}, {pipeline_mode = #tpu.pipeline_mode<synchronous>, transform_indices = @transform_11, window_bounds = array<i64: 1, 16>}, {pipeline_mode = #tpu.pipeline_mode<synchronous>, transform_indices = @transform_12, window_bounds = array<i64: 32, 16>}, {pipeline_mode = #tpu.pipeline_mode<synchronous>, transform_indices = @transform_13, window_bounds = array<i64: 1, 16>}, {pipeline_mode = #tpu.pipeline_mode<synchronous>, transform_indices = @transform_14, window_bounds = array<i64: 64, 16>}, {pipeline_mode = #tpu.pipeline_mode<synchronous>, transform_indices = @transform_15, window_bounds = array<i64: 4, 16>}, {pipeline_mode = #tpu.pipeline_mode<synchronous>, transform_indices = @transform_16, window_bounds = array<i64: 4, 16>}, {pipeline_mode = #tpu.pipeline_mode<synchronous>, transform_indices = @transform_17, window_bounds = array<i64: 4, 1>}, {transform_indices = @transform_18, window_bounds = array<i64: 1, 4, 8, 8>}]} {
    %c0_i32 = arith.constant 0 : i32
    %0 = arith.cmpi eq, %arg1, %c0_i32 : i32
    %1 = arith.extui %0 : i1 to i32
    %c0_i32_0 = arith.constant 0 : i32
    %2 = arith.cmpi ne, %1, %c0_i32_0 : i32
    scf.if %2 {
      %c0_53 = arith.constant 0 : index
      %c0_54 = arith.constant 0 : index
      %c0_55 = arith.constant 0 : index
      %103 = vector.load %arg3[%c0_53, %c0_54, %c0_55] : memref<1x8x32xbf16, #tpu.memory_space<vmem>>, vector<1x8x32xbf16>
      %104 = vector.shape_cast %103 : vector<1x8x32xbf16> to vector<8x32xbf16>
      %c0_56 = arith.constant 0 : index
      %c0_57 = arith.constant 0 : index
      %105 = vector.load %arg10[%c0_56, %c0_57] : memref<32x16xbf16, #tpu.memory_space<vmem>>, vector<32x16xbf16>
      %cst_58 = arith.constant dense<0.000000e+00> : vector<8x16xf32>
      %106 = tpu.matmul %104, %105, %cst_58 {dimension_numbers = #tpu.dot_dimension_numbers<[1], [0], [0], [1], [0, 0, 1, 1], [], []>} : vector<8x32xbf16>, vector<32x16xbf16>, vector<8x16xf32> -> vector<8x16xf32>
      %c0_59 = arith.constant 0 : index
      %c0_60 = arith.constant 0 : index
      %107 = vector.load %arg11[%c0_59, %c0_60] : memref<1x16xf32, #tpu.memory_space<vmem>>, vector<1x16xf32>
      %108 = vector.broadcast %107 : vector<1x16xf32> to vector<8x16xf32>
      %109 = arith.addf %106, %108 : vector<8x16xf32>
      %cst_61 = arith.constant 0.000000e+00 : f32
      %110 = vector.broadcast %cst_61 : f32 to vector<8x16xf32>
      %111 = arith.cmpf ogt, %109, %110 : vector<8x16xf32>
      %cst_62 = arith.constant 0.00999999977 : f32
      %112 = vector.broadcast %cst_62 : f32 to vector<8x16xf32>
      %113 = arith.mulf %112, %109 : vector<8x16xf32>
      %114 = arith.select %111, %109, %113 : vector<8x16xi1>, vector<8x16xf32>
      %c0_63 = arith.constant 0 : index
      %c0_64 = arith.constant 0 : index
      %115 = vector.load %arg14[%c0_63, %c0_64] : memref<32x16xbf16, #tpu.memory_space<vmem>>, vector<32x16xbf16>
      %cst_65 = arith.constant dense<0.000000e+00> : vector<8x16xf32>
      %116 = tpu.matmul %104, %115, %cst_65 {dimension_numbers = #tpu.dot_dimension_numbers<[1], [0], [0], [1], [0, 0, 1, 1], [], []>} : vector<8x32xbf16>, vector<32x16xbf16>, vector<8x16xf32> -> vector<8x16xf32>
      %c0_66 = arith.constant 0 : index
      %c0_67 = arith.constant 0 : index
      %117 = vector.load %arg15[%c0_66, %c0_67] : memref<1x16xf32, #tpu.memory_space<vmem>>, vector<1x16xf32>
      %118 = vector.broadcast %117 : vector<1x16xf32> to vector<8x16xf32>
      %119 = arith.addf %116, %118 : vector<8x16xf32>
      %c0_68 = arith.constant 0 : index
      %c0_69 = arith.constant 0 : index
      %120 = vector.load %arg6[%c0_68, %c0_69] : memref<8x16xf32, #tpu.memory_space<vmem>>, vector<8x16xf32>
      %c0_70 = arith.constant 0 : index
      %c0_71 = arith.constant 0 : index
      %121 = vector.load %arg7[%c0_70, %c0_71] : memref<8x16xf32, #tpu.memory_space<vmem>>, vector<8x16xf32>
      %122 = tpu.iota {dimensions = array<i32: 1>} : vector<8x16xi32>
      %c2_i32_72 = arith.constant 2 : i32
      %c0_i32_73 = arith.constant 0 : i32
      %123 = arith.cmpi eq, %c2_i32_72, %c0_i32_73 : i32
      %c1_i32_74 = arith.constant 1 : i32
      %124 = arith.select %123, %c1_i32_74, %c2_i32_72 : i32
      %125 = vector.broadcast %124 : i32 to vector<8x16xi32>
      %126 = arith.remsi %122, %125 : vector<8x16xi32>
      %c0_i32_75 = arith.constant 0 : i32
      %127 = vector.broadcast %c0_i32_75 : i32 to vector<8x16xi32>
      %128 = arith.cmpi ne, %126, %127 : vector<8x16xi32>
      %c0_i32_76 = arith.constant 0 : i32
      %129 = vector.broadcast %c0_i32_76 : i32 to vector<8x16xi32>
      %130 = arith.cmpi slt, %126, %129 : vector<8x16xi32>
      %c0_i32_77 = arith.constant 0 : i32
      %131 = arith.cmpi slt, %124, %c0_i32_77 : i32
      %132 = vector.broadcast %131 : i1 to vector<8x16xi1>
      %133 = vector.broadcast %132 : vector<8x16xi1> to vector<8x16xi1>
      %134 = arith.xori %130, %133 : vector<8x16xi1>
      %135 = arith.andi %134, %128 : vector<8x16xi1>
      %136 = vector.broadcast %124 : i32 to vector<8x16xi32>
      %137 = arith.addi %126, %136 : vector<8x16xi32>
      %138 = arith.select %135, %137, %126 : vector<8x16xi1>, vector<8x16xi32>
      %c0_i32_78 = arith.constant 0 : i32
      %139 = vector.broadcast %c0_i32_78 : i32 to vector<8x16xi32>
      %140 = arith.cmpi eq, %138, %139 : vector<8x16xi32>
      %c15_i32_79 = arith.constant 15 : i32
      %141 = tpu.dynamic_rotate %119 by %c15_i32_79 dim 1 : vector<8x16xf32>, i32 -> vector<8x16xf32>
      %c1_i32_80 = arith.constant 1 : i32
      %142 = tpu.dynamic_rotate %119 by %c1_i32_80 dim 1 : vector<8x16xf32>, i32 -> vector<8x16xf32>
      %cst_81 = arith.constant 0.000000e+00 : f32
      %143 = vector.broadcast %cst_81 : f32 to vector<8x16xf32>
      %144 = arith.subf %143, %141 : vector<8x16xf32>
      %145 = arith.select %140, %144, %142 : vector<8x16xi1>, vector<8x16xf32>
      %146 = arith.mulf %119, %120 : vector<8x16xf32>
      %147 = arith.mulf %145, %121 : vector<8x16xf32>
      %148 = arith.addf %146, %147 : vector<8x16xf32>
      %149 = arith.negf %148 : vector<8x16xf32>
      %150 = math.exp %149 : vector<8x16xf32>
      %cst_82 = arith.constant 1.000000e+00 : f32
      %151 = vector.broadcast %cst_82 : f32 to vector<8x16xf32>
      %152 = arith.addf %151, %150 : vector<8x16xf32>
      %153 = arith.divf %151, %152 : vector<8x16xf32>
      %154 = arith.addf %114, %153 : vector<8x16xf32>
      %155 = arith.truncf %154 : vector<8x16xf32> to vector<8x16xbf16>
      %c0_83 = arith.constant 0 : index
      %c0_84 = arith.constant 0 : index
      %156 = vector.load %arg16[%c0_83, %c0_84] : memref<64x16xbf16, #tpu.memory_space<vmem>>, vector<64x16xbf16>
      %cst_85 = arith.constant dense<0.000000e+00> : vector<64x8xf32>
      %157 = tpu.matmul %156, %155, %cst_85 {dimension_numbers = #tpu.dot_dimension_numbers<[1], [1], [0], [0], [0, 0, 1, 0], [], []>} : vector<64x16xbf16>, vector<8x16xbf16>, vector<64x8xf32> -> vector<64x8xf32>
      %158 = arith.truncf %157 : vector<64x8xf32> to vector<64x8xbf16>
      %c0_86 = arith.constant 0 : index
      %c0_87 = arith.constant 0 : index
      %159 = vector.load %arg21[%c0_86, %c0_87] : memref<64x8xbf16, #tpu.memory_space<vmem>>, vector<64x8xbf16>
      tpu.vector_store %arg21[%c0_86, %c0_87], %158 {strides = array<i32>} : memref<64x8xbf16, #tpu.memory_space<vmem>>, vector<64x8xbf16>,
      %c0_88 = arith.constant 0 : index
      %c0_89 = arith.constant 0 : index
      %160 = vector.load %arg18[%c0_88, %c0_89] : memref<4x16xbf16, #tpu.memory_space<vmem>>, vector<4x16xbf16>
      %cst_90 = arith.constant dense<0.000000e+00> : vector<4x8xf32>
      %161 = tpu.matmul %160, %155, %cst_90 {dimension_numbers = #tpu.dot_dimension_numbers<[1], [1], [0], [0], [0, 0, 1, 0], [], []>} : vector<4x16xbf16>, vector<8x16xbf16>, vector<4x8xf32> -> vector<4x8xf32>
      %c0_91 = arith.constant 0 : index
      %c0_92 = arith.constant 0 : index
      %162 = vector.load %arg19[%c0_91, %c0_92] : memref<4x1xf32, #tpu.memory_space<vmem>>, vector<4x1xf32>
      %163 = vector.broadcast %162 : vector<4x1xf32> to vector<4x8xf32>
      %164 = arith.addf %161, %163 : vector<4x8xf32>
      %c0_93 = arith.constant 0 : index
      %c0_94 = arith.constant 0 : index
      %165 = vector.load %arg22[%c0_93, %c0_94] : memref<4x8xf32, #tpu.memory_space<vmem>>, vector<4x8xf32>
      tpu.vector_store %arg22[%c0_93, %c0_94], %164 {strides = array<i32>} : memref<4x8xf32, #tpu.memory_space<vmem>>, vector<4x8xf32>,
    } else {
    }
    %c0 = arith.constant 0 : index
    %c0_1 = arith.constant 0 : index
    %c0_2 = arith.constant 0 : index
    %3 = vector.load %arg2[%c0, %c0_1, %c0_2] : memref<1x8x32xbf16, #tpu.memory_space<vmem>>, vector<1x8x32xbf16>
    %4 = vector.shape_cast %3 : vector<1x8x32xbf16> to vector<8x32xbf16>
    %c0_3 = arith.constant 0 : index
    %c0_4 = arith.constant 0 : index
    %5 = vector.load %arg8[%c0_3, %c0_4] : memref<32x16xbf16, #tpu.memory_space<vmem>>, vector<32x16xbf16>
    %cst = arith.constant dense<0.000000e+00> : vector<8x16xf32>
    %6 = tpu.matmul %4, %5, %cst {dimension_numbers = #tpu.dot_dimension_numbers<[1], [0], [0], [1], [0, 0, 1, 1], [], []>} : vector<8x32xbf16>, vector<32x16xbf16>, vector<8x16xf32> -> vector<8x16xf32>
    %c0_5 = arith.constant 0 : index
    %c0_6 = arith.constant 0 : index
    %7 = vector.load %arg9[%c0_5, %c0_6] : memref<1x16xf32, #tpu.memory_space<vmem>>, vector<1x16xf32>
    %8 = vector.broadcast %7 : vector<1x16xf32> to vector<8x16xf32>
    %9 = arith.addf %6, %8 : vector<8x16xf32>
    %cst_7 = arith.constant 0.000000e+00 : f32
    %10 = vector.broadcast %cst_7 : f32 to vector<8x16xf32>
    %11 = arith.cmpf ogt, %9, %10 : vector<8x16xf32>
    %cst_8 = arith.constant 0.00999999977 : f32
    %12 = vector.broadcast %cst_8 : f32 to vector<8x16xf32>
    %13 = arith.mulf %12, %9 : vector<8x16xf32>
    %14 = arith.select %11, %9, %13 : vector<8x16xi1>, vector<8x16xf32>
    %c0_9 = arith.constant 0 : index
    %c0_10 = arith.constant 0 : index
    %15 = vector.load %arg12[%c0_9, %c0_10] : memref<32x16xbf16, #tpu.memory_space<vmem>>, vector<32x16xbf16>
    %cst_11 = arith.constant dense<0.000000e+00> : vector<8x16xf32>
    %16 = tpu.matmul %4, %15, %cst_11 {dimension_numbers = #tpu.dot_dimension_numbers<[1], [0], [0], [1], [0, 0, 1, 1], [], []>} : vector<8x32xbf16>, vector<32x16xbf16>, vector<8x16xf32> -> vector<8x16xf32>
    %c0_12 = arith.constant 0 : index
    %c0_13 = arith.constant 0 : index
    %17 = vector.load %arg13[%c0_12, %c0_13] : memref<1x16xf32, #tpu.memory_space<vmem>>, vector<1x16xf32>
    %18 = vector.broadcast %17 : vector<1x16xf32> to vector<8x16xf32>
    %19 = arith.addf %16, %18 : vector<8x16xf32>
    %c0_14 = arith.constant 0 : index
    %c0_15 = arith.constant 0 : index
    %20 = vector.load %arg4[%c0_14, %c0_15] : memref<8x16xf32, #tpu.memory_space<vmem>>, vector<8x16xf32>
    %c0_16 = arith.constant 0 : index
    %c0_17 = arith.constant 0 : index
    %21 = vector.load %arg5[%c0_16, %c0_17] : memref<8x16xf32, #tpu.memory_space<vmem>>, vector<8x16xf32>
    %22 = tpu.iota {dimensions = array<i32: 1>} : vector<8x16xi32>
    %c2_i32 = arith.constant 2 : i32
    %c0_i32_18 = arith.constant 0 : i32
    %23 = arith.cmpi eq, %c2_i32, %c0_i32_18 : i32
    %c1_i32 = arith.constant 1 : i32
    %24 = arith.select %23, %c1_i32, %c2_i32 : i32
    %25 = vector.broadcast %24 : i32 to vector<8x16xi32>
    %26 = arith.remsi %22, %25 : vector<8x16xi32>
    %c0_i32_19 = arith.constant 0 : i32
    %27 = vector.broadcast %c0_i32_19 : i32 to vector<8x16xi32>
    %28 = arith.cmpi ne, %26, %27 : vector<8x16xi32>
    %c0_i32_20 = arith.constant 0 : i32
    %29 = vector.broadcast %c0_i32_20 : i32 to vector<8x16xi32>
    %30 = arith.cmpi slt, %26, %29 : vector<8x16xi32>
    %c0_i32_21 = arith.constant 0 : i32
    %31 = arith.cmpi slt, %24, %c0_i32_21 : i32
    %32 = vector.broadcast %31 : i1 to vector<8x16xi1>
    %33 = vector.broadcast %32 : vector<8x16xi1> to vector<8x16xi1>
    %34 = arith.xori %30, %33 : vector<8x16xi1>
    %35 = arith.andi %34, %28 : vector<8x16xi1>
    %36 = vector.broadcast %24 : i32 to vector<8x16xi32>
    %37 = arith.addi %26, %36 : vector<8x16xi32>
    %38 = arith.select %35, %37, %26 : vector<8x16xi1>, vector<8x16xi32>
    %c0_i32_22 = arith.constant 0 : i32
    %39 = vector.broadcast %c0_i32_22 : i32 to vector<8x16xi32>
    %40 = arith.cmpi eq, %38, %39 : vector<8x16xi32>
    %c15_i32 = arith.constant 15 : i32
    %41 = tpu.dynamic_rotate %19 by %c15_i32 dim 1 : vector<8x16xf32>, i32 -> vector<8x16xf32>
    %c1_i32_23 = arith.constant 1 : i32
    %42 = tpu.dynamic_rotate %19 by %c1_i32_23 dim 1 : vector<8x16xf32>, i32 -> vector<8x16xf32>
    %cst_24 = arith.constant 0.000000e+00 : f32
    %43 = vector.broadcast %cst_24 : f32 to vector<8x16xf32>
    %44 = arith.subf %43, %41 : vector<8x16xf32>
    %45 = arith.select %40, %44, %42 : vector<8x16xi1>, vector<8x16xf32>
    %46 = arith.mulf %19, %20 : vector<8x16xf32>
    %47 = arith.mulf %45, %21 : vector<8x16xf32>
    %48 = arith.addf %46, %47 : vector<8x16xf32>
    %49 = arith.negf %48 : vector<8x16xf32>
    %50 = math.exp %49 : vector<8x16xf32>
    %cst_25 = arith.constant 1.000000e+00 : f32
    %51 = vector.broadcast %cst_25 : f32 to vector<8x16xf32>
    %52 = arith.addf %51, %50 : vector<8x16xf32>
    %53 = arith.divf %51, %52 : vector<8x16xf32>
    %54 = arith.addf %14, %53 : vector<8x16xf32>
    %55 = arith.truncf %54 : vector<8x16xf32> to vector<8x16xbf16>
    %c0_26 = arith.constant 0 : index
    %c0_27 = arith.constant 0 : index
    %56 = vector.load %arg17[%c0_26, %c0_27] : memref<4x16xbf16, #tpu.memory_space<vmem>>, vector<4x16xbf16>
    %cst_28 = arith.constant dense<0.000000e+00> : vector<8x4xf32>
    %57 = tpu.matmul %55, %56, %cst_28 {dimension_numbers = #tpu.dot_dimension_numbers<[1], [1], [0], [0], [0, 0, 1, 0], [], []>} : vector<8x16xbf16>, vector<4x16xbf16>, vector<8x4xf32> -> vector<8x4xf32>
    %c0_29 = arith.constant 0 : index
    %c0_30 = arith.constant 0 : index
    %58 = vector.load %arg22[%c0_29, %c0_30] : memref<4x8xf32, #tpu.memory_space<vmem>>, vector<4x8xf32>
    %c0_31 = arith.constant 0 : index
    %c0_32 = arith.constant 0 : index
    %59 = vector.load %arg21[%c0_31, %c0_32] : memref<64x8xbf16, #tpu.memory_space<vmem>>, vector<16x8xbf16>
    %cst_33 = arith.constant dense<0.000000e+00> : vector<8x8xf32>
    %60 = tpu.matmul %55, %59, %cst_33 {dimension_numbers = #tpu.dot_dimension_numbers<[1], [0], [0], [1], [0, 0, 1, 1], [], []>} : vector<8x16xbf16>, vector<16x8xbf16>, vector<8x8xf32> -> vector<8x8xf32>
    %61 = vector.extract_strided_slice %57 {offsets = [0, 0], sizes = [8, 1], strides = [1, 1]} : vector<8x4xf32> to vector<8x1xf32>
    %62 = vector.broadcast %61 : vector<8x1xf32> to vector<8x8xf32>
    %63 = arith.addf %60, %62 : vector<8x8xf32>
    %64 = vector.extract_strided_slice %58 {offsets = [0, 0], sizes = [1, 8], strides = [1, 1]} : vector<4x8xf32> to vector<1x8xf32>
    %65 = vector.broadcast %64 : vector<1x8xf32> to vector<8x8xf32>
    %66 = arith.addf %63, %65 : vector<8x8xf32>
    %c0_34 = arith.constant 0 : index
    %c0_35 = arith.constant 0 : index
    %c0_36 = arith.constant 0 : index
    %c0_37 = arith.constant 0 : index
    %67 = vector.load %arg20[%c0_34, %c0_35, %c0_36, %c0_37] : memref<1x4x8x8xf32, #tpu.memory_space<vmem>>, vector<1x1x8x8xf32>
    %68 = vector.shape_cast %67 : vector<1x1x8x8xf32> to vector<8x8xf32>
    %69 = vector.shape_cast %66 : vector<8x8xf32> to vector<1x1x8x8xf32>
    tpu.vector_store %arg20[%c0_34, %c0_35, %c0_36, %c0_37], %69 {strides = array<i32>} : memref<1x4x8x8xf32, #tpu.memory_space<vmem>>, vector<1x1x8x8xf32>,
    %c16 = arith.constant 16 : index
    %c0_38 = arith.constant 0 : index
    %70 = vector.load %arg21[%c16, %c0_38] : memref<64x8xbf16, #tpu.memory_space<vmem>>, vector<16x8xbf16>
    %cst_39 = arith.constant dense<0.000000e+00> : vector<8x8xf32>
    %71 = tpu.matmul %55, %70, %cst_39 {dimension_numbers = #tpu.dot_dimension_numbers<[1], [0], [0], [1], [0, 0, 1, 1], [], []>} : vector<8x16xbf16>, vector<16x8xbf16>, vector<8x8xf32> -> vector<8x8xf32>
    %72 = vector.extract_strided_slice %57 {offsets = [0, 1], sizes = [8, 1], strides = [1, 1]} : vector<8x4xf32> to vector<8x1xf32>
    %73 = vector.broadcast %72 : vector<8x1xf32> to vector<8x8xf32>
    %74 = arith.addf %71, %73 : vector<8x8xf32>
    %75 = vector.extract_strided_slice %58 {offsets = [1, 0], sizes = [1, 8], strides = [1, 1]} : vector<4x8xf32> to vector<1x8xf32>
    %76 = vector.broadcast %75 : vector<1x8xf32> to vector<8x8xf32>
    %77 = arith.addf %74, %76 : vector<8x8xf32>
    %c0_40 = arith.constant 0 : index
    %c1 = arith.constant 1 : index
    %c0_41 = arith.constant 0 : index
    %c0_42 = arith.constant 0 : index
    %78 = vector.load %arg20[%c0_40, %c1, %c0_41, %c0_42] : memref<1x4x8x8xf32, #tpu.memory_space<vmem>>, vector<1x1x8x8xf32>
    %79 = vector.shape_cast %78 : vector<1x1x8x8xf32> to vector<8x8xf32>
    %80 = vector.shape_cast %77 : vector<8x8xf32> to vector<1x1x8x8xf32>
    tpu.vector_store %arg20[%c0_40, %c1, %c0_41, %c0_42], %80 {strides = array<i32>} : memref<1x4x8x8xf32, #tpu.memory_space<vmem>>, vector<1x1x8x8xf32>,
    %c32 = arith.constant 32 : index
    %c0_43 = arith.constant 0 : index
    %81 = vector.load %arg21[%c32, %c0_43] : memref<64x8xbf16, #tpu.memory_space<vmem>>, vector<16x8xbf16>
    %cst_44 = arith.constant dense<0.000000e+00> : vector<8x8xf32>
    %82 = tpu.matmul %55, %81, %cst_44 {dimension_numbers = #tpu.dot_dimension_numbers<[1], [0], [0], [1], [0, 0, 1, 1], [], []>} : vector<8x16xbf16>, vector<16x8xbf16>, vector<8x8xf32> -> vector<8x8xf32>
    %83 = vector.extract_strided_slice %57 {offsets = [0, 2], sizes = [8, 1], strides = [1, 1]} : vector<8x4xf32> to vector<8x1xf32>
    %84 = vector.broadcast %83 : vector<8x1xf32> to vector<8x8xf32>
    %85 = arith.addf %82, %84 : vector<8x8xf32>
    %86 = vector.extract_strided_slice %58 {offsets = [2, 0], sizes = [1, 8], strides = [1, 1]} : vector<4x8xf32> to vector<1x8xf32>
    %87 = vector.broadcast %86 : vector<1x8xf32> to vector<8x8xf32>
    %88 = arith.addf %85, %87 : vector<8x8xf32>
    %c0_45 = arith.constant 0 : index
    %c2 = arith.constant 2 : index
    %c0_46 = arith.constant 0 : index
    %c0_47 = arith.constant 0 : index
    %89 = vector.load %arg20[%c0_45, %c2, %c0_46, %c0_47] : memref<1x4x8x8xf32, #tpu.memory_space<vmem>>, vector<1x1x8x8xf32>
    %90 = vector.shape_cast %89 : vector<1x1x8x8xf32> to vector<8x8xf32>
    %91 = vector.shape_cast %88 : vector<8x8xf32> to vector<1x1x8x8xf32>
    tpu.vector_store %arg20[%c0_45, %c2, %c0_46, %c0_47], %91 {strides = array<i32>} : memref<1x4x8x8xf32, #tpu.memory_space<vmem>>, vector<1x1x8x8xf32>,
    %c48 = arith.constant 48 : index
    %c0_48 = arith.constant 0 : index
    %92 = vector.load %arg21[%c48, %c0_48] : memref<64x8xbf16, #tpu.memory_space<vmem>>, vector<16x8xbf16>
    %cst_49 = arith.constant dense<0.000000e+00> : vector<8x8xf32>
    %93 = tpu.matmul %55, %92, %cst_49 {dimension_numbers = #tpu.dot_dimension_numbers<[1], [0], [0], [1], [0, 0, 1, 1], [], []>} : vector<8x16xbf16>, vector<16x8xbf16>, vector<8x8xf32> -> vector<8x8xf32>
    %94 = vector.extract_strided_slice %57 {offsets = [0, 3], sizes = [8, 1], strides = [1, 1]} : vector<8x4xf32> to vector<8x1xf32>
    %95 = vector.broadcast %94 : vector<8x1xf32> to vector<8x8xf32>
    %96 = arith.addf %93, %95 : vector<8x8xf32>
    %97 = vector.extract_strided_slice %58 {offsets = [3, 0], sizes = [1, 8], strides = [1, 1]} : vector<4x8xf32> to vector<1x8xf32>
    %98 = vector.broadcast %97 : vector<1x8xf32> to vector<8x8xf32>
    %99 = arith.addf %96, %98 : vector<8x8xf32>
    %c0_50 = arith.constant 0 : index
    %c3 = arith.constant 3 : index
    %c0_51 = arith.constant 0 : index
    %c0_52 = arith.constant 0 : index
    %100 = vector.load %arg20[%c0_50, %c3, %c0_51, %c0_52] : memref<1x4x8x8xf32, #tpu.memory_space<vmem>>, vector<1x1x8x8xf32>
    %101 = vector.shape_cast %100 : vector<1x1x8x8xf32> to vector<8x8xf32>
    %102 = vector.shape_cast %99 : vector<8x8xf32> to vector<1x1x8x8xf32>
    tpu.vector_store %arg20[%c0_50, %c3, %c0_51, %c0_52], %102 {strides = array<i32>} : memref<1x4x8x8xf32, #tpu.memory_space<vmem>>, vector<1x1x8x8xf32>,
    return
  }
  func.func @transform_0(%arg0: i32, %arg1: i32) -> (i32, i32, i32) {
    %c0_i32 = arith.constant 0 : i32
    %c0_i32_0 = arith.constant 0 : i32
    return %arg0, %arg1, %c0_i32 : i32, i32, i32
  }
  func.func @transform_1(%arg0: i32, %arg1: i32) -> (i32, i32, i32) {
    %c0_i32 = arith.constant 0 : i32
    %c0_i32_0 = arith.constant 0 : i32
    %c0_i32_1 = arith.constant 0 : i32
    return %arg0, %c0_i32, %c0_i32_0 : i32, i32, i32
  }
  func.func @transform_2(%arg0: i32, %arg1: i32) -> (i32, i32) {
    %c0_i32 = arith.constant 0 : i32
    %c0_i32_0 = arith.constant 0 : i32
    return %arg1, %c0_i32 : i32, i32
  }
  func.func @transform_3(%arg0: i32, %arg1: i32) -> (i32, i32) {
    %c0_i32 = arith.constant 0 : i32
    %c0_i32_0 = arith.constant 0 : i32
    return %arg1, %c0_i32 : i32, i32
  }
  func.func @transform_4(%arg0: i32, %arg1: i32) -> (i32, i32) {
    %c0_i32 = arith.constant 0 : i32
    %c0_i32_0 = arith.constant 0 : i32
    %c0_i32_1 = arith.constant 0 : i32
    return %c0_i32, %c0_i32_0 : i32, i32
  }
  func.func @transform_5(%arg0: i32, %arg1: i32) -> (i32, i32) {
    %c0_i32 = arith.constant 0 : i32
    %c0_i32_0 = arith.constant 0 : i32
    %c0_i32_1 = arith.constant 0 : i32
    return %c0_i32, %c0_i32_0 : i32, i32
  }
  func.func @transform_6(%arg0: i32, %arg1: i32) -> (i32, i32) {
    %c0_i32 = arith.constant 0 : i32
    %c0_i32_0 = arith.constant 0 : i32
    %c0_i32_1 = arith.constant 0 : i32
    return %c0_i32, %c0_i32_0 : i32, i32
  }
  func.func @transform_7(%arg0: i32, %arg1: i32) -> (i32, i32) {
    %c0_i32 = arith.constant 0 : i32
    %c0_i32_0 = arith.constant 0 : i32
    %c0_i32_1 = arith.constant 0 : i32
    return %c0_i32, %c0_i32_0 : i32, i32
  }
  func.func @transform_8(%arg0: i32, %arg1: i32) -> (i32, i32) {
    %c0_i32 = arith.constant 0 : i32
    %c0_i32_0 = arith.constant 0 : i32
    %c0_i32_1 = arith.constant 0 : i32
    return %c0_i32, %c0_i32_0 : i32, i32
  }
  func.func @transform_9(%arg0: i32, %arg1: i32) -> (i32, i32) {
    %c0_i32 = arith.constant 0 : i32
    %c0_i32_0 = arith.constant 0 : i32
    %c0_i32_1 = arith.constant 0 : i32
    return %c0_i32, %c0_i32_0 : i32, i32
  }
  func.func @transform_10(%arg0: i32, %arg1: i32) -> (i32, i32) {
    %c0_i32 = arith.constant 0 : i32
    %c0_i32_0 = arith.constant 0 : i32
    %c0_i32_1 = arith.constant 0 : i32
    return %c0_i32, %c0_i32_0 : i32, i32
  }
  func.func @transform_11(%arg0: i32, %arg1: i32) -> (i32, i32) {
    %c0_i32 = arith.constant 0 : i32
    %c0_i32_0 = arith.constant 0 : i32
    %c0_i32_1 = arith.constant 0 : i32
    return %c0_i32, %c0_i32_0 : i32, i32
  }
  func.func @transform_12(%arg0: i32, %arg1: i32) -> (i32, i32) {
    %c0_i32 = arith.constant 0 : i32
    %c0_i32_0 = arith.constant 0 : i32
    %c0_i32_1 = arith.constant 0 : i32
    return %c0_i32, %c0_i32_0 : i32, i32
  }
  func.func @transform_13(%arg0: i32, %arg1: i32) -> (i32, i32) {
    %c0_i32 = arith.constant 0 : i32
    %c0_i32_0 = arith.constant 0 : i32
    %c0_i32_1 = arith.constant 0 : i32
    return %c0_i32, %c0_i32_0 : i32, i32
  }
  func.func @transform_14(%arg0: i32, %arg1: i32) -> (i32, i32) {
    %c0_i32 = arith.constant 0 : i32
    %c0_i32_0 = arith.constant 0 : i32
    %c0_i32_1 = arith.constant 0 : i32
    return %c0_i32, %c0_i32_0 : i32, i32
  }
  func.func @transform_15(%arg0: i32, %arg1: i32) -> (i32, i32) {
    %c0_i32 = arith.constant 0 : i32
    %c0_i32_0 = arith.constant 0 : i32
    %c0_i32_1 = arith.constant 0 : i32
    return %c0_i32, %c0_i32_0 : i32, i32
  }
  func.func @transform_16(%arg0: i32, %arg1: i32) -> (i32, i32) {
    %c0_i32 = arith.constant 0 : i32
    %c0_i32_0 = arith.constant 0 : i32
    %c0_i32_1 = arith.constant 0 : i32
    return %c0_i32, %c0_i32_0 : i32, i32
  }
  func.func @transform_17(%arg0: i32, %arg1: i32) -> (i32, i32) {
    %c0_i32 = arith.constant 0 : i32
    %c0_i32_0 = arith.constant 0 : i32
    %c0_i32_1 = arith.constant 0 : i32
    return %c0_i32, %c0_i32_0 : i32, i32
  }
  func.func @transform_18(%arg0: i32, %arg1: i32) -> (i32, i32, i32, i32) {
    %c0_i32 = arith.constant 0 : i32
    %c0_i32_0 = arith.constant 0 : i32
    %c0_i32_1 = arith.constant 0 : i32
    return %arg0, %c0_i32, %arg1, %c0_i32_0 : i32, i32, i32, i32
  }
}

</mosaic_0001>

<bundles_post_ra>
// kernel: tpu_custom_call.1
= control target key start
LH: loop header
LB: loop body
LE: loop exit
PB: predicated region body
PF: predicated region fallthrough
CT: control target
= control target key end

     0   :  { %s2287_s0 = inlined_call_operand.vmem [shape: bf16[2,8,32], index: 0, kind: input, shape index: {}]   ;;  %s2288_s1 = inlined_call_operand.vmem [shape: bf16[2,8,32], index: 1, kind: input, shape index: {}]   ;;  %s2289_s2 = inlined_call_operand.vmem [shape: f32[8,16], index: 2, kind: input, shape index: {}]   ;;  %s2290_s3 = inlined_call_operand.vmem [shape: f32[8,16], index: 3, kind: input, shape index: {}]   ;;  %s2291_s4 = inlined_call_operand.vmem [shape: f32[8,16], index: 4, kind: input, shape index: {}]   ;;  %s2292_s5 = inlined_call_operand.vmem [shape: f32[8,16], index: 5, kind: input, shape index: {}]   ;;  %s2293_s6 = inlined_call_operand.vmem [shape: bf16[32,16], index: 6, kind: input, shape index: {}]   ;;  %s2294_s7 = inlined_call_operand.vmem [shape: f32[1,16], index: 7, kind: input, shape index: {}]   ;;  %s2295_s8 = inlined_call_operand.vmem [shape: bf16[32,16], index: 8, kind: input, shape index: {}]   ;;  %s2296_s9 = inlined_call_operand.vmem [shape: f32[1,16], index: 9, kind: input, shape index: {}]   ;;  %s2297_s10 = inlined_call_operand.vmem [shape: bf16[32,16], index: 10, kind: input, shape index: {}]   ;;  %s2298_s11 = inlined_call_operand.vmem [shape: f32[1,16], index: 11, kind: input, shape index: {}]   ;;  %s2299_s12 = inlined_call_operand.vmem [shape: bf16[32,16], index: 12, kind: input, shape index: {}]   ;;  %s2300_s13 = inlined_call_operand.vmem [shape: f32[1,16], index: 13, kind: input, shape index: {}]   ;;  %s2301_s14 = inlined_call_operand.vmem [shape: bf16[64,16], index: 14, kind: input, shape index: {}]   ;;  %s2302_s15 = inlined_call_operand.vmem [shape: bf16[4,16], index: 15, kind: input, shape index: {}]   ;;  %s2303_s16 = inlined_call_operand.vmem [shape: bf16[4,16], index: 16, kind: input, shape index: {}]   ;;  %s2304_s17 = inlined_call_operand.vmem [shape: f32[4,1], index: 17, kind: input, shape index: {}]   ;;  %s2305_s18 = inlined_call_operand.hbm [shape: f32[2,4,8,8], index: 18, kind: output, shape index: {}]  }
   0x1   :  { %2313 = sst [smem:[#allocation11_spill]] %s2287_s0 }
   0x2   :  { %2314 = sst [smem:[#allocation12_spill]] %s2288_s1 }
   0x3   :  { %2315 = sst [smem:[#allocation13_spill]] %s2289_s2 }
   0x4   :  { %2316 = sst [smem:[#allocation14_spill]] %s2299_s12 }
   0x5   :  { %23 = vsyncpa [#allocation5], 0 }
   0x6   :  { %25 = vsyncpa [#allocation5 + $0x1], 0  ;;  %s2008_s27 = smov 0   ;;  %s2010_s28 = smov 0  }
   0x7   :  { %s2012_s29 = smov 0   ;;  %s2014_s30 = smov 0  }
   0x8   :  { %s2016_s0 = smov 0   ;;  %s2018_s19 = smov 0  }
   0x9 LB: > { %2317 = sst [smem:[#allocation7_spill]] %s1887_s29  ;;  %s1570_s1 = sadd.s32 4294967295, %s1899_s19   ;;  %s1899_s19 = sphi %s2018_s19, %s31_s19   ;;  %s1895_s0 = sphi %s2016_s0, %s2335_s0   ;;  %s1891_s30 = sphi %s2014_s30, %s2334_s30   ;;  %s1887_s29 = sphi %s2012_s29, %s2333_s29   ;;  %s1883_s28 = sphi %s2010_s28, %s2337_s28   ;;  %s1879_s27 = sphi %s2008_s27, %s2336_s27  }
   0xa   : > { %2318 = sst [smem:[#allocation8_spill]] %s1895_s0  ;;  %s1571_s20 = sadd.s32 4294967294, %s1899_s19  }
   0xb   : > { %s43_s21 = sadd.s32 1, %s1895_s0  ;;  %s452_s22 = sadd.s32 1, %s1887_s29 }
   0xc   : > { %p45_p0 = scmp.ge.s32.totalorder %s43_s21, 2  ;;  %p462_p1 = scmp.ne.s32.totalorder %s1887_s29, %s1883_s28 }
   0xd   : > { %p463_p2 = scmp.eq.s32.totalorder %s1570_s1, 1  ;;  %p468_p3 = scmp.ne.s32.totalorder %s1883_s28, %s1879_s27 }
   0xe   : > { %s2339_s21 = smov (%p45_p0, %s43_s21), 0  ;;  %p469_p5 = scmp.eq.s32.totalorder %s1571_s20, 1 }
   0xf   : > { %2319 = sst [smem:[#allocation9_spill]] %s2339_s21  ;;  %p2048_p4 = por %p463_p2, %p462_p1 }
  0x10   : > { %s447_s23 = ssub.s32 %s1895_s0, %s2339_s21  ;;  %p1576_p6 = scmp.ge.s32.totalorder %s1899_s19, 1 }
  0x11   : > { %p450_p7 = scmp.eq.s32.totalorder %s447_s23, 0  ;;  %p2055_p8 = por %p469_p5, %p468_p3 }
  0x12   : > { %p560_p9 = scmp.lt.s32.totalorder %s1899_s19, 3 }
  0x13   : > { %s2061_s25 = scalar_select %p450_p7, %s1887_s29, %s452_s22  }
  0x14   : > { %p561_p10 = pnand %p1576_p6, %p560_p9 }
  0x15   : > { %2322 = sst [smem:[#allocation10_spill]] %s2061_s25  ;;  %s2323_s12 = sld [smem:[#allocation14_spill]] (!%p561_p10)  ;;  %v1901_v1 = vmov (!%p561_p10), 0.0   ;;  %vm1902_vm0 = vmmov (!%p561_p10), 0   ;;  %vm676_vm1 = vcmask (!%p561_p10), 261120   ;;  %v1803_v4 = vld [vmem:[%s2295_s8] sm:$0xff] (!%p561_p10)   ;;  %v788_v22 = vlaneseq (!%p561_p10) }
  0x16   : > { %564 = sbr.rel (%p561_p10) target bundleno = 1628 (0x65c), region = 92  ;;  %1658 = vmatprep.subr.bf16.mxu1 (!%p561_p10), %v1901_v1  ;;  %1650 = vmatprep.subr.bf16.mxu0 (!%p561_p10), %v1901_v1  ;;  %p628_p11 = scmp.lt.s32.totalorder (!%p561_p10), %s1891_s30, 1  ;;  %v1804_v5 = vld [vmem:[%s2295_s8 + $0x8] sm:$0xff] (!%p561_p10)   ;;  %v1584_v6 = vld [vmem:[%s2300_s13] ss:$0 sm:$0xff] (!%p561_p10)  ;;  %vm803_vm2 = vcmask (!%p561_p10), 1047680  }
  0x17   : > { %1662 = vmatprep.mubr.msk.bf16.mxu1 (!%p561_p10), %vm1902_vm0, %v1901_v1  ;;  %1654 = vmatprep.mubr.msk.bf16.mxu0 (!%p561_p10), %vm1902_vm0, %v1901_v1  ;;  %s2324_s23 = sld [smem:[#allocation12_spill]] (!%p561_p10)  ;;  %s2309_s29 = smov (!%p561_p10), 127   ;;  %v1805_v21 = vld [vmem:[%s2301_s14] sm:$0xff] (!%p561_p10)   ;;  %vm859_vm3 = vcmask (!%p561_p10), 130048   ;;  %v789_v23 = vand.u32 (!%p561_p10), 127, %v788_v22  ;;  %v1806_v45 = vld [vmem:[%s2301_s14 + $0x8] sm:$0xff] (!%p561_p10)  }
  0x18   : > { %1651 = vmatpush3.bf16.msra.mxu0 (!%p561_p10), %v1803_v4  ;;  %s2310_s0 = smov (!%p561_p10), 113   ;;  %v786_v27 = vld [vmem:[%s2291_s4] sm:$0xff] (!%p561_p10)  ;;  %v1808_v47 = vld [vmem:[%s2301_s14 + $0x10] sm:$0xff] (!%p561_p10)   ;;  %v1810_v48 = vld [vmem:[%s2297_s10 + $0x8] sm:$0xff] (!%p561_p10)   ;;  %s2327_s21 = sld [smem:[#allocation11_spill]] (!%p561_p10)  ;;  %vm944_vm6 = vcmask (!%p561_p10), 64512  }
  0x19   : > { %1652 = vmatprep.subr.bf16.mxu0 (!%p561_p10), %v1901_v1  ;;  %v794_v24 = vand.u32 (!%p561_p10), 1, %v789_v23  ;;  %v787_v28 = vld [vmem:[%s2292_s5] sm:$0xff] (!%p561_p10)  ;;  %v1809_v49 = vld [vmem:[%s2301_s14 + $0x18] sm:$0xff] (!%p561_p10)   ;;  %v1812_v61 = vld [vmem:[%s2293_s6 + $0x8] sm:$0xff] (!%p561_p10)   ;;  %s2331_s20 = sld [smem:[#allocation13_spill]] (!%p561_p10)  ;;  %vm999_vm7 = vcmask (!%p561_p10), 60416  }
  0x1a   : > { %v1580_v37 = vld [vmem:[%s2296_s9] ss:$0 sm:$0xff] (!%p561_p10)  ;;  %s1620_s1 = sshll.u32 (!%p561_p10), %s1891_s30, 9 }
  0x1b   : > { %v1801_v0 = vld [vmem:[%s2323_s12] sm:$0xff] (!%p561_p10)   ;;  %v1802_v2 = vld [vmem:[%s2323_s12 + $0x8] sm:$0xff] (!%p561_p10)   ;;  %vm2112_vm4 = vcmp.eq.s32.totalorder (!%p561_p10), %v794_v24, 0 }
  0x1c   : > { %1659 = vmatpush3.bf16.msra.mxu1 (!%p561_p10), %v1801_v0  ;;  %1653 = vmatpush3.bf16.msra.mxu0 (!%p561_p10), %v1804_v5  ;;  %v1807_v46 = vld [vmem:[%s2297_s10] sm:$0xff] (!%p561_p10)  }
  0x1d   : > { %1660 = vmatprep.subr.bf16.mxu1 %v1901_v1  ;;  %s2078_s22 = scalar_select %p628_p11, %s1891_s30, 1  ;;  %v949_v57 = vld [vmem:[%s2303_s16] sm:$0x3] }
  0x1e   : > { %v1811_v58 = vld [vmem:[%s2293_s6] sm:$0xff]  }
  0x1f   : > { %s1578_s26 = sshll.u32 %s2078_s22, 2  ;;  %v1602_v4 = vld [vmem:[%s2298_s11] ss:$0 sm:$0xff]  ;;  %s2330_s22 = smov 127  }
  0x20   : > { %1661 = vmatpush3.bf16.msra.mxu1 %v1802_v2  ;;  %s638_s12 = scalar_lea.vmem %s2324_s23, %s1578_s26 }
  0x21   : > { %1676 = vmatprep.subr.bf16.mxu1 %v1901_v1  ;;  %v652_v3 = vld [vmem:[%s638_s12] sm:$0xf]  ;;  %s2311_s12 = smov 16  }
  0x22   : > { %1655 = vmatmul.mubr.msk.bf16.vlgmr.msra.gmra.mrb[0].mxu0 %vm676_vm1, %v652_v3 }
  0x23   : > { %1663 = vmatmul.mubr.msk.bf16.vlgmr.msra.gmra.mrb[0].mxu1 %vm676_vm1, %v652_v3  ;;  %1668 = vmatprep.mubr.msk.bf16.mxu0 %vm859_vm3, %v1805_v21 }
  0x24   : > { %1678 = vmatprep.mubr.msk.bf16.mxu1 %vm1902_vm0, %v1901_v1 }
  0xf5   : > { %v714_v17 = vpop.f32.mrb[0].mxu0 }
  0xf6   : > { %v780_v7 = vpop.f32.mrb[0].mxu1  ;;  %v1656_v18 = vpop.f32.mrb[1].mxu0  ;;  %v715_v38 = vadd.f32 %v1580_v37, %v714_v17 }
  0xf7   : > { %v781_v8 = vadd.f32 %v1584_v6, %v780_v7  ;;  %v1664_v9 = vpop.f32.mrb[1].mxu1  ;;  %v717_v19 = vpop.f32.mrb[2].mxu0 }
  0xf8   : > { %v783_v10 = vpop.f32.mrb[2].mxu1  ;;  %v1657_v20 = vpop.f32.mrb[3].mxu0  ;;  %v721_v39 = vmul.f32 0.01, %v715_v38  ;;  %vm720_vm5 = vcmp.gt.f32.partialorder %v715_v38, 0.0 }
  0xf9   : > { %804 = vrot.lane.b32.xlu0 %v781_v8, %s2311_s12  ;;  %v1665_v11 = vpop.f32.mrb[3].mxu1  ;;  %v820_v31 = vmul.f32 %v786_v27, %v781_v8  ;;  %v1906_v10 = vmov 0   ;;  %v1180_v27 = vld [vmem:[%s2302_s15] sm:$0x3] }
  0xfa   : > { %v722_v41 = vsel %vm720_vm5, %v715_v38, %v721_v39  ;;  %1795 = vset.pattern.permute.xlu0 %v1906_v10  ;;  %1796 = vset.pattern.permute.xlu1 %v1906_v10  ;;  %v1276_v10 = vshrl.u32 %v788_v22, 7 }
 0x16b   : > { %v805_v12 = vpop.permute.xlu0 %804 }
 0x16c   : > { %v806_v13 = vsel %vm803_vm2, %v805_v12, %v781_v8 }
 0x16d   : > { %807 = vrot.lane.b32.xlu0 %v806_v13, %s2311_s12  ;;  %s634_s12 = scalar_lea.vmem %s2327_s21, %s1578_s26  ;;  %s2328_s21 = smov 16  }
 0x16e   : > { %v1001_v50 = vld [vmem:[%s634_s12] sm:$0xf]  ;;  %s2329_s12 = smov 113   ;;  %s625_s26 = sand.u32 1, %s1883_s28  }
 0x16f   : > { %s1577_s25 = sshll.u32 %s625_s26, 5  ;;  %s2241_s30 = scalar_lea.sflag [#allocation5], %s625_s26 }
 0x1df   : > { %v808_v14 = vpop.permute.xlu0 %807 }
 0x1e0   : > { %v809_v15 = vsel %vm803_vm2, %v808_v14, %v781_v8 }
 0x1e1   : > { %v810_v16 = vsub.f32 0.0, %v809_v15 }
 0x1e3   : > { %812 = vrot.lane.b32.xlu1 %v810_v16, %s2309_s29  ;;  %v950_v16 = vld [vmem:[%s2304_s17] sm:$0xf]  ;;  %s627_s29 = scalar_lea.vmem [#allocation4], %s1577_s25 }
 0x1e4   : > { %s1453_s23 = sshll.u32 %s627_s29, 4  ;;  %s2236_s23 = int_to_ptr.vmem [resolvable:$true] %s1453_s23 }
 0x1e7   : > { %816 = vrot.lane.b32.xlu1 %v809_v15, %s2310_s0  ;;  %s1910_s0 = smov [#allocation4]  }
 0x1e8   : > { %s1825_s25 = sshll.u32 %s1910_s0, 4  ;;  %s1826_s25 = int_to_ptr.vmem [resolvable:$false] %s1825_s25 }
 0x1e9   : > { %p1828_p1 = scmp.lt.s32.totalorder %s2236_s23, %s1826_s25 }
 0x255   : > { %v813_v25 = vpop.permute.xlu1 %812 }
 0x259   : > { %v817_v29 = vpop.permute.xlu1 %816 }
 0x25a   : > { %v819_v30 = vsel %vm2112_vm4, %v813_v25, %v817_v29  ;;  %v1907_v29 = vmov 2  }
 0x25b   : > { %v821_v32 = vmul.f32 %v819_v30, %v787_v28  ;;  %v1186_v28 = vsel %vm859_vm3, %v1180_v27, 0  ;;  %v1135_v30 = vld [vmem:[%s2331_s20] sm:$0xff]  ;;  %v1433_v27 = vsub.s32 3, %v1276_v10 }
 0x25d   : > { %v822_v33 = vadd.f32 %v821_v32, %v820_v31  ;;  %v1136_v31 = vld [vmem:[%s2290_s3] sm:$0xff] }
 0x25f   : > { %v1588_v34 = vmul.f32 -1.442695, %v822_v33 }
 0x261   : > { %1813 = vpow2.f32 %v1588_v34 }
 0x26b   : > { %v1814_v35 = vpop.eup %1813 }
 0x26c   : > { %v826_v36 = vadd.f32 1.0, %v1814_v35 }
 0x26e   : > { %1815 = vrcp.f32 %v826_v36 }
 0x278   : > { %v1816_v40 = vpop.eup %1815 }
 0x279   : > { %v829_v42 = vadd.f32 %v1816_v40, %v722_v41 }
 0x27b   : > { %v830_v43 = vpack.c.bf16 %v829_v42, %v829_v42 }
 0x27d   : > { %1728 = vmatprep.subr.msk.bf16.mxu0 %vm859_vm3, %v830_v43  ;;  %v873_v44 = vsel %vm859_vm3, %v830_v43, 0  ;;  %v1598_v43 = vld [vmem:[%s2294_s7] ss:$0 sm:$0xff] }
 0x27e   : > { %1667 = vmatpush3.bf16.xpose.msra.mxu0 %v873_v44  ;;  %1677 = vmatpush3.bf16.xpose.msra.mxu1 %v873_v44 }
 0x27f   : > { %1690 = vmatprep.subr.bf16.mxu0 %v1901_v1  ;;  %1682 = vmatprep.subr.bf16.mxu1 %v1901_v1 }
 0x285   : > { %1669 = vmatmul.mubr.msk.bf16.vlgmr.msra.gmra.mrb[4].mxu0 %vm859_vm3, %v1806_v45  ;;  %1679 = vmatmul.mubr.msk.bf16.vlgmr.msra.gmra.mrb[4].mxu1 %vm859_vm3, %v949_v57 }
 0x286   : > { %1691 = vmatpush3.bf16.msra.mxu0 %v1807_v46  ;;  %1672 = vmatprep.mubr.msk.bf16.mxu0 %vm859_vm3, %v1808_v47 }
 0x287   : > { %1692 = vmatprep.subr.bf16.mxu0 %v1901_v1  ;;  %1683 = vmatpush3.bf16.msra.mxu1 %v1811_v58 }
 0x288   : > { %1686 = vmatprep.mubr.msk.bf16.mxu1 %vm1902_vm0, %v1901_v1  ;;  %1684 = vmatprep.subr.bf16.mxu1 %v1901_v1 }
 0x28a   : > { %1693 = vmatpush3.bf16.msra.mxu0 %v1810_v48 }
 0x28b   : > { %1704 = vmatprep.subr.bf16.mxu0 %v1901_v1  ;;  %1685 = vmatpush3.bf16.msra.mxu1 %v1812_v61  ;;  %v1909_v61 = vmov 3  }
 0x28c   : > { %1698 = vmatprep.subr.bf16.mxu1 %v1901_v1 }
 0x28d   : > { %1673 = vmatmul.mubr.msk.bf16.gmra.mrb[8].mxu0 %vm859_vm3, %v1809_v49 }
 0x28e   : > { %1694 = vmatprep.mubr.msk.bf16.mxu0 %vm1902_vm0, %v1901_v1  ;;  %1687 = vmatmul.mubr.msk.bf16.vlgmr.msra.gmra.mrb[8].mxu1 %vm676_vm1, %v1001_v50 }
 0x28f   : > { %1700 = vmatprep.mubr.msk.bf16.mxu1 %vm1902_vm0, %v1901_v1 }
 0x294   : > { %1699 = vmatpush3.bf16.xpose.msra.mxu1 %v1186_v28 }
 0x295   : > { %1695 = vmatmul.mubr.msk.bf16.vlgmr.msra.gmra.mrb[12].mxu0 %vm676_vm1, %v1001_v50  ;;  %1710 = vmatprep.subr.bf16.mxu1 %v1901_v1 }
 0x296   : > { %1706 = vmatprep.mubr.msk.bf16.mxu0 %vm1902_vm0, %v1901_v1 }
 0x358   : > { %v1670_v51 = vpop.f32.mrb[4].mxu0  ;;  %v993_v17 = vpop.f32.mrb[4].mxu1 }
 0x359   : > { %v909_v52 = vpop.f32.mrb[5].mxu0  ;;  %v1680_v18 = vpop.f32.mrb[5].mxu1 }
 0x35a   : > { %v1671_v53 = vpop.f32.mrb[6].mxu0  ;;  %v996_v19 = vpop.f32.mrb[6].mxu1 }
 0x35b   : > { %v941_v54 = vpack.c.bf16 %v1671_v53, %v1670_v51  ;;  %v912_v55 = vpop.f32.mrb[7].mxu0  ;;  %v1681_v20 = vpop.f32.mrb[7].mxu1 }
 0x35c   : > { %v940_v56 = vpack.c.bf16 %v912_v55, %v909_v52  ;;  %v1329_v20 = vsub.s32 1, %v1276_v10 }
 0x35d   : > { %946 = vst.msk [vmem:[#allocation2 + $0x8] sm:$0xff] %vm944_vm6, %v941_v54 }
 0x35e   : > { %945 = vst.msk [vmem:[#allocation2] sm:$0xff] %vm944_vm6, %v940_v56 }
 0x360   : > { %v1674_v59 = vpop.f32.mrb[8].mxu0 }
 0x361   : > { %v925_v60 = vpop.f32.mrb[9].mxu0  ;;  %v1063_v21 = vpop.f32.mrb[8].mxu1 }
 0x362   : > { %v1675_v62 = vpop.f32.mrb[10].mxu0  ;;  %v1688_v23 = vpop.f32.mrb[9].mxu1  ;;  %v1064_v44 = vadd.f32 %v1598_v43, %v1063_v21 }
 0x363   : > { %v943_v63 = vpack.c.bf16 %v1675_v62, %v1674_v59  ;;  %v928_v0 = vpop.f32.mrb[11].mxu0  ;;  %v1066_v24 = vpop.f32.mrb[10].mxu1 }
 0x364   : > { %v942_v2 = vpack.c.bf16 %v928_v0, %v925_v60  ;;  %v1689_v25 = vpop.f32.mrb[11].mxu1  ;;  %v1070_v45 = vmul.f32 0.01, %v1064_v44  ;;  %vm1069_vm8 = vcmp.gt.f32.partialorder %v1064_v44, 0.0  ;;  %v1282_v49 = vld [vmem:[#allocation2 + $0x8] sm:$0xff]  ;;  %v1908_v60 = vmov 1  }
 0x365   : > { %948 = vst.msk [vmem:[#allocation2 + $0x18] sm:$0xff] %vm944_vm6, %v943_v63  ;;  %v1229_v3 = vld [vmem:[#allocation2] sm:$0xff] }
 0x366   : > { %947 = vst.msk [vmem:[#allocation2 + $0x10] sm:$0xff] %vm944_vm6, %v942_v2  ;;  %1705 = vmatpush3.bf16.msra.mxu0 %v1229_v3  ;;  %v1071_v46 = vsel %vm1069_vm8, %v1064_v44, %v1070_v45 }
 0x367   : > { %1716 = vmatprep.subr.bf16.mxu0 %v1901_v1 }
 0x368   : > { %v1129_v5 = vpop.f32.mrb[12].mxu0 }
 0x369   : > { %v1130_v6 = vadd.f32 %v1602_v4, %v1129_v5  ;;  %v1696_v7 = vpop.f32.mrb[13].mxu0 }
 0x36a   : > { %v1132_v8 = vpop.f32.mrb[14].mxu0 }
 0x36b   : > { %1153 = vrot.lane.b32.xlu0 %v1130_v6, %s2328_s21  ;;  %v1697_v9 = vpop.f32.mrb[15].mxu0  ;;  %v1169_v35 = vmul.f32 %v1135_v30, %v1130_v6 }
 0x36c   : > { %v1386_v51 = vld [vmem:[#allocation2 + $0x18] sm:$0xff] }
 0x36d   : > { %v1334_v50 = vld [vmem:[#allocation2 + $0x10] sm:$0xff] }
 0x3dd   : > { %v1154_v11 = vpop.permute.xlu0 %1153 }
 0x3de   : > { %v1155_v12 = vsel %vm803_vm2, %v1154_v11, %v1130_v6  ;;  %v1381_v11 = vsub.s32 2, %v1276_v10 }
 0x3df   : > { %1156 = vrot.lane.b32.xlu1 %v1155_v12, %s2328_s21  ;;  %v1277_v12 = vsub.s32 0, %v1276_v10 }
 0x451   : > { %v1157_v13 = vpop.permute.xlu1 %1156 }
 0x452   : > { %v1158_v14 = vsel %vm803_vm2, %v1157_v13, %v1130_v6 }
 0x453   : > { %1165 = vrot.lane.b32.xlu1 %v1158_v14, %s2329_s12  ;;  %v1159_v15 = vsub.f32 0.0, %v1158_v14  ;;  %s2234_s12 = scalar_lea.hbm %s2305_s18, %s1620_s1  ;;  %s1827_s1 = scalar_lea.vmem %s1826_s25, 1024 }
 0x455   : > { %1161 = vrot.lane.b32.xlu0 %v1159_v15, %s2330_s22  ;;  %s1821_s22 = scalar_lea.vmem %s2236_s23, 512 }
 0x456   : > { %p1822_p12 = scmp.ne.s32.totalorder %s2236_s23, %s1821_s22  ;;  %p1829_p2 = scmp.lt.s32.totalorder %s1827_s1, %s1821_s22 }
 0x458   : > { %p1823_p13 = pnand %p1822_p12, %p2048_p4  ;;  %p1830_p3 = por %p1829_p2, %p1828_p1 }
 0x459   : > { %953 = vperm.xlu0 %1795, %v950_v16  }
 0x45a   : > { %p1824_p0 = pneg %p1823_p13 }
 0x45c   : > { %p1831_p5 = pnand %p1830_p3, %p1824_p0 }
 0x45d   : > { %1798 = vset.pattern.permute.xlu0 %v1907_v29 }
 0x4c5   : > { %v1166_v32 = vpop.permute.xlu1 %1165 }
 0x4c7   : > { %v1162_v33 = vpop.permute.xlu0 %1161 }
 0x4c8   : > { %v1168_v34 = vsel %vm2112_vm4, %v1162_v33, %v1166_v32 }
 0x4c9   : > { %v1170_v36 = vmul.f32 %v1168_v34, %v1136_v31 }
 0x4cb   : > { %v1171_v37 = vadd.f32 %v1170_v36, %v1169_v35 }
 0x4cd   : > { %v1606_v38 = vmul.f32 -1.442695, %v1171_v37 }
 0x4cf   : > { %1817 = vpow2.f32 %v1606_v38 }
 0x4d8   : > { %v954_v39 = vpop.permute.xlu0 %953 }
 0x4d9   : > { %v1818_v40 = vpop.eup %1817  ;;  %v994_v41 = vadd.f32 %v993_v17, %v954_v39 }
 0x4da   : > { %v1175_v42 = vadd.f32 1.0, %v1818_v40 }
 0x4db   : > { %1000 = vst.msk [vmem:[#allocation3] sm:$0xf] %vm999_vm7, %v994_v41 }
 0x4dc   : > { %1819 = vrcp.f32 %v1175_v42 }
 0x4e2   : > { %v1228_v13 = vld [vmem:[#allocation3] sm:$0xf] }
 0x4e3   : > { %v1382_v16 = vrot.slane %v1228_v13, %v1381_v11  ;;  %v1278_v18 = vrot.slane %v1228_v13, %v1277_v12  ;;  %v1330_v24 = vrot.slane %v1228_v13, %v1329_v20  ;;  %v1434_v30 = vrot.slane %v1228_v13, %v1433_v27 }
 0x4e6   : > { %v1820_v26 = vpop.eup %1819 }
 0x4e7   : > { %v1178_v47 = vadd.f32 %v1820_v26, %v1071_v46 }
 0x4e9   : > { %v1179_v48 = vpack.c.bf16 %v1178_v47, %v1178_v47 }
 0x4eb   : > { %1701 = vmatmul.mubr.msk.bf16.vlgmr.msra.gmra.mrb[12].mxu1 %vm859_vm3, %v1179_v48  ;;  %1707 = vmatmul.mubr.msk.bf16.vlgmr.msra.gmra.mrb[16].mxu0 %vm859_vm3, %v1179_v48 }
 0x4ec   : > { %1711 = vmatpush3.bf16.msra.mxu1 %v1282_v49  ;;  %1717 = vmatpush3.bf16.msra.mxu0 %v1334_v50 }
 0x4ed   : > { %1712 = vmatprep.mubr.msk.bf16.mxu1 %vm1902_vm0, %v1901_v1  ;;  %1718 = vmatprep.mubr.msk.bf16.mxu0 %vm1902_vm0, %v1901_v1 }
 0x4ee   : > { %1722 = vmatprep.subr.bf16.mxu1 %v1901_v1 }
 0x4f3   : > { %1713 = vmatmul.mubr.msk.bf16.vlgmr.msra.gmra.mrb[16].mxu1 %vm859_vm3, %v1179_v48  ;;  %1719 = vmatmul.mubr.msk.bf16.vlgmr.msra.gmra.mrb[20].mxu0 %vm859_vm3, %v1179_v48 }
 0x4f4   : > { %1723 = vmatpush3.bf16.msra.mxu1 %v1386_v51  ;;  %1724 = vmatprep.mubr.msk.bf16.mxu1 %vm1902_vm0, %v1901_v1 }
 0x4fb   : > { %1725 = vmatmul.mubr.msk.bf16.vlgmr.msra.gmra.mrb[20].mxu1 %vm859_vm3, %v1179_v48 }
 0x5be   : > { %v1222_v52 = vpop.f32.mrb[12].mxu1  ;;  %v1269_v53 = vpop.f32.mrb[16].mxu0 }
 0x5bf   : > { %v1708_v54 = vpop.f32.mrb[17].mxu0  ;;  %1336 = vperm.xlu0 %1798, %v1222_v52   ;;  %1232 = vperm.xlu1 %1796, %v1222_v52   ;;  %v1702_v55 = vpop.f32.mrb[13].mxu1 }
 0x5c0   : > { %v1225_v56 = vpop.f32.mrb[14].mxu1  ;;  %v1272_v57 = vpop.f32.mrb[18].mxu0 }
 0x5c1   : > { %v1703_v58 = vpop.f32.mrb[15].mxu1  ;;  %v1709_v59 = vpop.f32.mrb[19].mxu0 }
 0x5c3   : > { %1797 = vset.pattern.permute.xlu1 %v1908_v60  ;;  %1800 = vset.pattern.permute.xlu0 %v1909_v61 }
 0x5c4   : > { %1284 = vperm.xlu1 %1797, %v1222_v52  }
 0x5c6   : > { %v1321_v62 = vpop.f32.mrb[16].mxu1  ;;  %v1373_v1 = vpop.f32.mrb[20].mxu0 }
 0x5c7   : > { %v1714_v63 = vpop.f32.mrb[17].mxu1  ;;  %v1720_v0 = vpop.f32.mrb[21].mxu0 }
 0x5c8   : > { %v1376_v2 = vpop.f32.mrb[22].mxu0  ;;  %1799 = vset.pattern.permute.xlu1 %v1909_v61  ;;  %v1324_v3 = vpop.f32.mrb[18].mxu1 }
 0x5c9   : > { %v1721_v4 = vpop.f32.mrb[23].mxu0  ;;  %1388 = vperm.xlu1 %1799, %v1222_v52   ;;  %v1715_v5 = vpop.f32.mrb[19].mxu1 }
 0x5ce   : > { %v1425_v6 = vpop.f32.mrb[20].mxu1 }
 0x5cf   : > { %v1726_v7 = vpop.f32.mrb[21].mxu1 }
 0x5d0   : > { %v1428_v8 = vpop.f32.mrb[22].mxu1 }
 0x5d1   : > { %v1727_v9 = vpop.f32.mrb[23].mxu1 }
 0x63e   : > { %v1337_v14 = vpop.permute.xlu0 %1336  ;;  %v1233_v15 = vpop.permute.xlu1 %1232 }
 0x63f   : > { %v1374_v17 = vadd.f32 %v1373_v1, %v1337_v14  ;;  %v1270_v19 = vadd.f32 %v1269_v53, %v1233_v15 }
 0x641   : > { %v1383_v21 = vadd.f32 %v1382_v16, %v1374_v17  ;;  %v1279_v23 = vadd.f32 %v1278_v18, %v1270_v19 }
 0x643   : > { %1612 = vst.msk [vmem:[%s627_s29 + $0x10] sm:$0xff] %vm944_vm6, %v1383_v21  ;;  %1281 = vst.msk [vmem:[%s627_s29] sm:$0xff] %vm944_vm6, %v1279_v23  ;;  %v1285_v22 = vpop.permute.xlu1 %1284 }
 0x644   : > { %v1322_v25 = vadd.f32 %v1321_v62, %v1285_v22 }
 0x646   : > { %v1331_v28 = vadd.f32 %v1330_v24, %v1322_v25 }
 0x648   : > { %1610 = vst.msk [vmem:[%s627_s29 + $0x8] sm:$0xff] %vm944_vm6, %v1331_v28  ;;  %v1389_v29 = vpop.permute.xlu1 %1388 }
 0x649   : > { %v1426_v31 = vadd.f32 %v1425_v6, %v1389_v29 }
 0x64b   : > { %v1435_v32 = vadd.f32 %v1434_v30, %v1426_v31 }
 0x64d   : > { %1614 = vst.msk [vmem:[%s627_s29 + $0x18] sm:$0xff] %vm944_vm6, %v1435_v32 }
 0x64e   : > { %1834 = shalt.err (!%p1831_p5)
}
 0x64f   : > { %s1835_s26 = scalar_lea.hbm %s2234_s12, 512  ;;  %s1839_s21 = scalar_lea.hbm %s2305_s18, 1024 }
 0x650   : > { %p1836_p6 = scmp.ne.s32.totalorder %s2234_s12, %s1835_s26  ;;  %p1840_p10 = scmp.lt.u32.totalorder %s2234_s12, %s2305_s18 }
 0x651   : > { %p1841_p11 = scmp.lt.u32.totalorder %s1839_s21, %s1835_s26  ;;  %p1843_p13 = scmp.lt.u32.totalorder %s1835_s26, %s2234_s12 }
 0x652   : > { %p1837_p7 = pnand %p1836_p6, %p2048_p4 }
 0x653   : > { %p1842_p12 = por %p1841_p11, %p1840_p10 }
 0x654   : > { %p1838_p9 = pneg %p1837_p7 }
 0x655   : > { %p1844_p0 = por %p1843_p13, %p1842_p12 }
 0x657   : > { %p1845_p1 = pnand %p1844_p0, %p1838_p9 }
 0x659   : > { %1848 = shalt.err (!%p1845_p1)
}
 0x65a   : > { %s1911_s22 = smov 128   ;;  %s1912_s1 = smov 8  }
 0x65b   : > { %1729 = dma.vmem_to_hbm [thread:$0]  (%p2048_p4), %s2236_s23, 512, %s2234_s12, %s2241_s30, %s1911_s22, %s1911_s22, %s1912_s1  }
 0x65c PF: > { %p1735_p2 = scmp.ge.s32.totalorder %s1899_s19, 2  ;;  %s1468_s29 = sand.u32 1, %s1879_s27  }
 0x65d   : > { %s1469_s26 = scalar_lea.sflag [#allocation5], %s1468_s29 }
 0x65e   : > { %p1732_p3 = pnand %p1735_p2, %p2055_p8 }
 0x660   : > { %1874 = dma.done.wait (!%p1732_p3), %s1469_s26, 512  }
 0x661   : > { %1876 = vsyncadd (!%p1732_p3), %s1469_s26, 4294966784  ;;  %s31_s19 = sadd.s32 1, %s1899_s19   ;;  %s2332_s20 = sld [smem:[#allocation7_spill]] }
 0x662   : > { %p28_p5 = scmp.ge.s32.totalorder %s31_s19, 4   ;;  %s2333_s29 = sld [smem:[#allocation10_spill]] }
 0x663   : > { %s2334_s30 = sld [smem:[#allocation8_spill]]  ;;  %s2335_s0 = sld [smem:[#allocation9_spill]] }
 0x664   : > { %s2336_s27 = smov %s1883_s28  ;;  %30 = sbr.rel (!%p28_p5) target bundleno = 9 (0x9), region = 143 }
 0x667   : > { %s2337_s28 = smov %s2332_s20 }
 0x66b   :  { %1474 = vsyncpa [#allocation5], 1 }
 0x66c   :  { %1476 = vsyncpa [#allocation5 + $0x1], 1 }

</bundles_post_ra>
